<compile_context>
chip_gen: v6e
topology: v6e:2x2x1
jax: 0.10.0
libtpu: 0.0.40
codegen_flags: <defaults>
</compile_context>

<pallas_src>
import jax
import jax.numpy as jnp
import numpy as np
from jax import lax
from jax.experimental import pallas as pl
from jax.experimental.pallas import tpu as pltpu


# ---------------------------------------------------------------------------
# Kernel A: readout column-sum accumulation.
#   csum = sum_n x[n, :]   (1, F), accumulated across the node-tile grid.
# ---------------------------------------------------------------------------
def colsum_kernel(x_ref, cs_ref):
    @pl.when(pl.program_id(0) == 0)
    def _():
        cs_ref[...] = jnp.zeros_like(cs_ref)

    cs_ref[...] += jnp.sum(x_ref[...], axis=0, keepdims=True)


# ---------------------------------------------------------------------------
# Kernel B: fused discriminator logits + BCE-with-logits (per-node).
#   x_ref    : (tm, F) positive-sample features
#   s_ref    : (tm, F) shuffled (negative-sample) features
#   v_ref    : (1, F)  folded discriminator vector  W_enc @ (W_disc @ c)
#   b_ref    : (1,)    discriminator bias (SMEM scalar)
#   loss_ref : (1, tm) per-node loss  BCE1(z1[n]) + BCE0(z2[n])
# ---------------------------------------------------------------------------
def bce_logits_kernel(x_ref, s_ref, v_ref, b_ref, loss_ref):
    v = v_ref[...]                                    # (1, F)
    b = b_ref[0]                                      # scalar bias from SMEM
    dn = (((1,), (1,)), ((), ()))                     # contract F with F

    # Lane-dense logits (1, tm): mat-vec on the MXU, BCE math on full vregs.
    z1 = lax.dot_general(v, x_ref[...], dn,
                         preferred_element_type=jnp.float32) + b
    z2 = lax.dot_general(v, s_ref[...], dn,
                         preferred_element_type=jnp.float32) + b

    # Numerically stable BCE-with-logits (PyTorch form):
    #   label = 1:  max(z,0) - z + log1p(exp(-|z|))
    #   label = 0:  max(z,0)     + log1p(exp(-|z|))
    l1 = jnp.maximum(z1, 0.0) - z1 + jnp.log1p(jnp.exp(-jnp.abs(z1)))
    l2 = jnp.maximum(z2, 0.0) + jnp.log1p(jnp.exp(-jnp.abs(z2)))

    loss_ref[...] = l1 + l2                           # disjoint per-program tile


# ---------------------------------------------------------------------------
# Wrapper
# ---------------------------------------------------------------------------
def _pick_tile(n):
    """Largest node tile: whole problem in one grid step when it fits,
    otherwise the biggest lane-aligned divisor (per-step VMEM footprint at
    F<=1024 stays far below even v7x's 64 MiB)."""
    if n <= 1024:
        return n
    for cand in (1024, 512, 256, 128):
        if n % cand == 0:
            return cand
    return n


def dgi_loss(x, perm, w_enc, w_disc, b_disc, *, tm=None):
    """DGI loss (fused).

    x      : (N, F) float32 node features
    perm   : (N,)   int32   random permutation (== torch.randperm)
    w_enc  : (F, H) float32 encoder weight
    w_disc : (H, H) float32 bilinear discriminator weight (Bilinear(H, H, 1))
    b_disc : ()     float32 bilinear discriminator bias
    """
    N, F = x.shape
    if tm is None:
        tm = _pick_tile(N)
    assert N % tm == 0 and tm % 8 == 0
    assert tm == N or tm % 128 == 0, "loss tile must be lane-aligned"
    gm = N // tm

    # TODO(synk): the real DGI model aggregates over `edge_index` with a GCN;
    # scatter-style graph convolution has no clean rectangular-tile Pallas
    # equivalent, so the synthetic encoder here is a per-node linear map.
    # TODO(synk): at graph scale, move this row gather into the kernel
    # (scalar-prefetch perm + manual DMA gather) instead of materializing a
    # second (N, F) copy of x in HBM.
    shuf = x[perm, :]

    vmem_cap = 32 * 1024 * 1024  # explicit; safe on v5e/v6e (128 MiB) and v7x (64 MiB)

    # ---- Kernel A: readout column-sum of x ---------------------------------
    csum = pl.pallas_call(
        colsum_kernel,
        out_shape=jax.ShapeDtypeStruct((1, F), jnp.float32),
        grid_spec=pltpu.PrefetchScalarGridSpec(
            num_scalar_prefetch=0,
            grid=(gm,),
            in_specs=[pl.BlockSpec((tm, F), lambda i: (i, 0))],
            out_specs=pl.BlockSpec((1, F), lambda i: (0, 0)),   # accumulator
        ),
        compiler_params=pltpu.CompilerParams(
            dimension_semantics=("arbitrary",),
            vmem_limit_bytes=vmem_cap),
    )(x)

    # ---- Glue: tiny O(F*H + H*H) folds -------------------------------------
    c = jax.nn.sigmoid((csum @ w_enc) / jnp.float32(N))   # (1, H) summary vector
    u = c @ w_disc.T                                      # (1, H) = (W_disc @ c)^T
    v = u @ w_enc.T                                       # (1, F) = (W_enc W_disc c)^T
    b = jnp.reshape(b_disc.astype(jnp.float32), (1,))     # SMEM scalar

    # ---- Kernel B: fused logits + BCE, lane-dense, parallel over tiles -----
    per_node = pl.pallas_call(
        bce_logits_kernel,
        out_shape=jax.ShapeDtypeStruct((1, N), jnp.float32),
        grid_spec=pltpu.PrefetchScalarGridSpec(
            num_scalar_prefetch=0,
            grid=(gm,),
            in_specs=[
                pl.BlockSpec((tm, F), lambda i: (i, 0)),
                pl.BlockSpec((tm, F), lambda i: (i, 0)),
                pl.BlockSpec((1, F), lambda i: (0, 0)),
                pl.BlockSpec(memory_space=pltpu.MemorySpace.SMEM),
            ],
            out_specs=pl.BlockSpec((1, tm), lambda i: (0, i)),
        ),
        compiler_params=pltpu.CompilerParams(
            dimension_semantics=("parallel",),   # disjoint output tiles: race-free
            vmem_limit_bytes=vmem_cap),
    )(x, shuf, v, b)

    # mean over 2N logits (labels: first N ones, second N zeros)
    return jnp.sum(per_node) / jnp.float32(2 * N)


# ---------------------------------------------------------------------------
# Pure-JAX reference (same synthetic model, literal h1/h2 path) to validate
# both the kernels and the algebraic collapse.
# ---------------------------------------------------------------------------
def dgi_loss_ref(x, perm, w_enc, w_disc, b_disc):
    N = x.shape[0]
    shuf = x[perm, :]
    h1 = x @ w_enc
    h2 = shuf @ w_enc
    c = jax.nn.sigmoid(jnp.mean(h1, axis=0))           # (H,)
    z1 = h1 @ (w_disc @ c) + b_disc                    # (N,)
    z2 = h2 @ (w_disc @ c) + b_disc                    # (N,)
    logits = jnp.concatenate([z1, z2], axis=0)         # (2N,)
    lbl = jnp.concatenate([jnp.ones(N), jnp.zeros(N)], axis=0)
    loss = jnp.maximum(logits, 0.0) - logits * lbl + jnp.log1p(
        jnp.exp(-jnp.abs(logits)))
    return jnp.mean(loss)


if __name__ == "__main__":
    N, F, H = 256, 32, 32  # nodes, feature dim, hidden dim

    key = jax.random.PRNGKey(0)
    kx, kp, kw1, kw2, kb = jax.random.split(key, 5)

    x = jax.random.normal(kx, (N, F), dtype=jnp.float32)
    perm = jax.random.permutation(kp, N).astype(jnp.int32)   # torch.randperm
    w_enc = jax.random.normal(kw1, (F, H), dtype=jnp.float32) * 0.1
    w_disc = jax.random.normal(kw2, (H, H), dtype=jnp.float32) * 0.1
    b_disc = jax.random.normal(kb, (), dtype=jnp.float32) * 0.1

    loss = jax.block_until_ready(dgi_loss(x, perm, w_enc, w_disc, b_disc))
    ref = jax.block_until_ready(dgi_loss_ref(x, perm, w_enc, w_disc, b_disc))

    np.testing.assert_allclose(np.asarray(loss), np.asarray(ref),
                               rtol=1e-5, atol=1e-5)
    print("KERNEL_OK")
</pallas_src>

<mosaic_0001>
module attributes {stable_mosaic.version = 11 : i64} {
  func.func @colsum_kernel(%arg0: i32, %arg1: memref<256x32xf32, #tpu.memory_space<vmem>>, %arg2: memref<1x32xf32, #tpu.memory_space<vmem>>) attributes {dimension_semantics = [#tpu.dimension_semantics<arbitrary>], iteration_bounds = array<i64: 1>, scalar_prefetch = 0 : i64, scratch_operands = 0 : i64, tpu.core_type = #tpu.core_type<tc>, window_params = [{transform_indices = @transform_0, window_bounds = array<i64: 256, 32>}, {pipeline_mode = #tpu.pipeline_mode<synchronous>, transform_indices = @transform_1, window_bounds = array<i64: 1, 32>}]} {
    %c0_i32 = arith.constant 0 : i32
    %0 = arith.cmpi eq, %arg0, %c0_i32 : i32
    %1 = arith.extui %0 : i1 to i32
    %c0_i32_0 = arith.constant 0 : i32
    %2 = arith.cmpi ne, %1, %c0_i32_0 : i32
    scf.if %2 {
      %cst_6 = arith.constant 0.000000e+00 : f32
      %9 = vector.broadcast %cst_6 : f32 to vector<1x32xf32>
      %c0_7 = arith.constant 0 : index
      %c0_8 = arith.constant 0 : index
      %10 = vector.load %arg2[%c0_7, %c0_8] : memref<1x32xf32, #tpu.memory_space<vmem>>, vector<1x32xf32>
      tpu.vector_store %arg2[%c0_7, %c0_8], %9 {strides = array<i32>} : memref<1x32xf32, #tpu.memory_space<vmem>>, vector<1x32xf32>,
    } else {
    }
    %c0 = arith.constant 0 : index
    %c0_1 = arith.constant 0 : index
    %3 = vector.load %arg2[%c0, %c0_1] : memref<1x32xf32, #tpu.memory_space<vmem>>, vector<1x32xf32>
    %c0_2 = arith.constant 0 : index
    %c0_3 = arith.constant 0 : index
    %4 = vector.load %arg1[%c0_2, %c0_3] : memref<256x32xf32, #tpu.memory_space<vmem>>, vector<256x32xf32>
    %cst = arith.constant dense<0.000000e+00> : vector<32xf32>
    %5 = vector.multi_reduction <add>, %4, %cst [0] : vector<256x32xf32> to vector<32xf32>
    %6 = vector.shape_cast %5 : vector<32xf32> to vector<1x32xf32>
    %7 = arith.addf %3, %6 : vector<1x32xf32>
    %c0_4 = arith.constant 0 : index
    %c0_5 = arith.constant 0 : index
    %8 = vector.load %arg2[%c0_4, %c0_5] : memref<1x32xf32, #tpu.memory_space<vmem>>, vector<1x32xf32>
    tpu.vector_store %arg2[%c0_4, %c0_5], %7 {strides = array<i32>} : memref<1x32xf32, #tpu.memory_space<vmem>>, vector<1x32xf32>,
    return
  }
  func.func @transform_0(%arg0: i32) -> (i32, i32) {
    %c0_i32 = arith.constant 0 : i32
    %c0_i32_0 = arith.constant 0 : i32
    return %arg0, %c0_i32 : i32, i32
  }
  func.func @transform_1(%arg0: i32) -> (i32, i32) {
    %c0_i32 = arith.constant 0 : i32
    %c0_i32_0 = arith.constant 0 : i32
    %c0_i32_1 = arith.constant 0 : i32
    return %c0_i32, %c0_i32_0 : i32, i32
  }
}

</mosaic_0001>

<bundles_post_ra>
// kernel: tpu_custom_call.1
= control target key start
LH: loop header
LB: loop body
LE: loop exit
PB: predicated region body
PF: predicated region fallthrough
CT: control target
= control target key end

     0   :  { %vm13_vm0 = vcmask 253952   ;;  %vm48_vm1 = vcmask 261120   ;;  %v159_v3 = vmov 0.0   ;;  %s304_s0 = inlined_call_operand.vmem [shape: f32[256,32], index: 0, kind: input, shape index: {}]   ;;  %s305_s1 = inlined_call_operand.hbm [shape: f32[1,32], index: 1, kind: output, shape index: {}]  }
   0x1   :  { %v16_v0 = vld [vmem:[%s304_s0] sm:$0xff]  ;;  %v17_v1 = vld [vmem:[%s304_s0 + $0x8] sm:$0xff]  ;;  %v18_v2 = vld [vmem:[%s304_s0 + $0x10] sm:$0xff]  ;;  %14 = vst.msk [vmem:[#allocation2] sm:$0x1] %vm13_vm0, %v159_v3 }
   0x2   :  { %v19_v4 = vld [vmem:[%s304_s0 + $0x18] sm:$0xff]  ;;  %v49_v5 = vsel %vm48_vm1, %v16_v0, 0.0  ;;  %v50_v6 = vsel %vm48_vm1, %v17_v1, 0.0  ;;  %v52_v7 = vsel %vm48_vm1, %v18_v2, 0.0  ;;  %v20_v8 = vld [vmem:[%s304_s0 + $0x20] sm:$0xff]  ;;  %v21_v11 = vld [vmem:[%s304_s0 + $0x28] sm:$0xff] }
   0x3   :  { %v51_v9 = vadd.f32 %v50_v6, %v49_v5  ;;  %v54_v10 = vsel %vm48_vm1, %v19_v4, 0.0  ;;  %v56_v13 = vsel %vm48_vm1, %v20_v8, 0.0  ;;  %v22_v14 = vld [vmem:[%s304_s0 + $0x30] sm:$0xff]  ;;  %v58_v16 = vsel %vm48_vm1, %v21_v11, 0.0  ;;  %v23_v17 = vld [vmem:[%s304_s0 + $0x38] sm:$0xff]  ;;  %v24_v20 = vld [vmem:[%s304_s0 + $0x40] sm:$0xff] }
   0x4   :  { %v60_v19 = vsel %vm48_vm1, %v22_v14, 0.0  ;;  %v62_v22 = vsel %vm48_vm1, %v23_v17, 0.0 }
   0x5   :  { %v53_v12 = vadd.f32 %v52_v7, %v51_v9 }
   0x7   :  { %v55_v15 = vadd.f32 %v54_v10, %v53_v12 }
   0x9   :  { %v57_v18 = vadd.f32 %v56_v13, %v55_v15 }
   0xb   :  { %v59_v21 = vadd.f32 %v58_v16, %v57_v18 }
   0xc   :  { %6 = vsyncpa [#allocation3], 0  ;;  %v25_v23 = vld [vmem:[%s304_s0 + $0x48] sm:$0xff]  ;;  %v64_v25 = vsel %vm48_vm1, %v24_v20, 0.0  ;;  %v26_v26 = vld [vmem:[%s304_s0 + $0x50] sm:$0xff]  ;;  %s160_s12 = smov [#allocation2]  }
   0xd   :  { %v61_v24 = vadd.f32 %v60_v19, %v59_v21  ;;  %v66_v28 = vsel %vm48_vm1, %v25_v23, 0.0  ;;  %v27_v29 = vld [vmem:[%s304_s0 + $0x58] sm:$0xff]  ;;  %v68_v31 = vsel %vm48_vm1, %v26_v26, 0.0  ;;  %v28_v32 = vld [vmem:[%s304_s0 + $0x60] sm:$0xff]  ;;  %v29_v35 = vld [vmem:[%s304_s0 + $0x68] sm:$0xff]  ;;  %s127_s13 = sshll.u32 %s160_s12, 4  ;;  %s128_s13 = int_to_ptr.vmem [resolvable:$true] %s127_s13 }
   0xe   :  { %v70_v34 = vsel %vm48_vm1, %v27_v29, 0.0  ;;  %v72_v37 = vsel %vm48_vm1, %v28_v32, 0.0  ;;  %v30_v38 = vld [vmem:[%s304_s0 + $0x70] sm:$0xff]  ;;  %v74_v40 = vsel %vm48_vm1, %v29_v35, 0.0  ;;  %v31_v41 = vld [vmem:[%s304_s0 + $0x78] sm:$0xff]  ;;  %v32_v44 = vld [vmem:[%s304_s0 + $0x80] sm:$0xff]  ;;  %p142_p1 = scmp.lt.s32.totalorder %s128_s13, %s128_s13 }
   0xf   :  { %v63_v27 = vadd.f32 %v62_v22, %v61_v24  ;;  %v76_v43 = vsel %vm48_vm1, %v30_v38, 0.0  ;;  %v78_v46 = vsel %vm48_vm1, %v31_v41, 0.0  ;;  %v33_v47 = vld [vmem:[%s304_s0 + $0x88] sm:$0xff]  ;;  %v80_v49 = vsel %vm48_vm1, %v32_v44, 0.0  ;;  %v34_v50 = vld [vmem:[%s304_s0 + $0x90] sm:$0xff]  ;;  %v35_v53 = vld [vmem:[%s304_s0 + $0x98] sm:$0xff] }
  0x10   :  { %v82_v52 = vsel %vm48_vm1, %v33_v47, 0.0  ;;  %v84_v55 = vsel %vm48_vm1, %v34_v50, 0.0  ;;  %v36_v56 = vld [vmem:[%s304_s0 + $0xa0] sm:$0xff]  ;;  %v86_v58 = vsel %vm48_vm1, %v35_v53, 0.0  ;;  %v37_v59 = vld [vmem:[%s304_s0 + $0xa8] sm:$0xff]  ;;  %v38_v62 = vld [vmem:[%s304_s0 + $0xb0] sm:$0xff] }
  0x11   :  { %v65_v30 = vadd.f32 %v64_v25, %v63_v27  ;;  %v88_v61 = vsel %vm48_vm1, %v36_v56, 0.0  ;;  %v90_v0 = vsel %vm48_vm1, %v37_v59, 0.0  ;;  %v39_v1 = vld [vmem:[%s304_s0 + $0xb8] sm:$0xff]  ;;  %v92_v3 = vsel %vm48_vm1, %v38_v62, 0.0  ;;  %v40_v4 = vld [vmem:[%s304_s0 + $0xc0] sm:$0xff]  ;;  %v41_v7 = vld [vmem:[%s304_s0 + $0xc8] sm:$0xff] }
  0x12   :  { %v94_v6 = vsel %vm48_vm1, %v39_v1, 0.0  ;;  %v96_v9 = vsel %vm48_vm1, %v40_v4, 0.0  ;;  %v42_v10 = vld [vmem:[%s304_s0 + $0xd0] sm:$0xff]  ;;  %v98_v12 = vsel %vm48_vm1, %v41_v7, 0.0  ;;  %v43_v13 = vld [vmem:[%s304_s0 + $0xd8] sm:$0xff]  ;;  %v44_v16 = vld [vmem:[%s304_s0 + $0xe0] sm:$0xff] }
  0x13   :  { %v67_v33 = vadd.f32 %v66_v28, %v65_v30  ;;  %v100_v15 = vsel %vm48_vm1, %v42_v10, 0.0  ;;  %v102_v18 = vsel %vm48_vm1, %v43_v13, 0.0  ;;  %v45_v19 = vld [vmem:[%s304_s0 + $0xe8] sm:$0xff]  ;;  %v104_v21 = vsel %vm48_vm1, %v44_v16, 0.0  ;;  %v46_v22 = vld [vmem:[%s304_s0 + $0xf0] sm:$0xff]  ;;  %v47_v25 = vld [vmem:[%s304_s0 + $0xf8] sm:$0xff] }
  0x14   :  { %v106_v24 = vsel %vm48_vm1, %v45_v19, 0.0  ;;  %v108_v27 = vsel %vm48_vm1, %v46_v22, 0.0  ;;  %v110_v29 = vsel %vm48_vm1, %v47_v25, 0.0  ;;  %s137_s0 = scalar_lea.vmem %s128_s13, 16  ;;  %s141_s14 = scalar_lea.vmem %s128_s13, 32 }
  0x15   :  { %v69_v36 = vadd.f32 %v68_v31, %v67_v33  ;;  %p138_p0 = scmp.ne.s32.totalorder %s128_s13, %s137_s0  ;;  %p143_p2 = scmp.lt.s32.totalorder %s141_s14, %s137_s0 }
  0x17   :  { %v71_v39 = vadd.f32 %v70_v34, %v69_v36  ;;  %p144_p3 = por %p143_p2, %p142_p1 }
  0x19   :  { %v73_v42 = vadd.f32 %v72_v37, %v71_v39  ;;  %v15_v37 = vld [vmem:[#allocation2] sm:$0x1]  ;;  %p145_p4 = pnand %p144_p3, %p138_p0 }
  0x1b   :  { %v75_v45 = vadd.f32 %v74_v40, %v73_v42 }
  0x1d   :  { %v77_v48 = vadd.f32 %v76_v43, %v75_v45 }
  0x1f   :  { %v79_v51 = vadd.f32 %v78_v46, %v77_v48 }
  0x21   :  { %v81_v54 = vadd.f32 %v80_v49, %v79_v51 }
  0x23   :  { %v83_v57 = vadd.f32 %v82_v52, %v81_v54 }
  0x25   :  { %v85_v60 = vadd.f32 %v84_v55, %v83_v57 }
  0x27   :  { %v87_v63 = vadd.f32 %v86_v58, %v85_v60 }
  0x29   :  { %v89_v2 = vadd.f32 %v88_v61, %v87_v63 }
  0x2b   :  { %v91_v5 = vadd.f32 %v90_v0, %v89_v2 }
  0x2d   :  { %v93_v8 = vadd.f32 %v92_v3, %v91_v5 }
  0x2f   :  { %v95_v11 = vadd.f32 %v94_v6, %v93_v8 }
  0x31   :  { %v97_v14 = vadd.f32 %v96_v9, %v95_v11 }
  0x33   :  { %v99_v17 = vadd.f32 %v98_v12, %v97_v14 }
  0x35   :  { %v101_v20 = vadd.f32 %v100_v15, %v99_v17 }
  0x37   :  { %v103_v23 = vadd.f32 %v102_v18, %v101_v20 }
  0x39   :  { %v105_v26 = vadd.f32 %v104_v21, %v103_v23 }
  0x3b   :  { %v107_v28 = vadd.f32 %v106_v24, %v105_v26 }
  0x3d   :  { %v109_v30 = vadd.f32 %v108_v27, %v107_v28 }
  0x3f   :  { %v111_v31 = vadd.f32 %v110_v29, %v109_v30 }
  0x41   :  { %v112_v32 = vrot.slane %v111_v31, 4 }
  0x43   :  { %v113_v33 = vadd.f32 %v112_v32, %v111_v31 }
  0x45   :  { %v114_v34 = vrot.slane %v113_v33, 2 }
  0x47   :  { %v115_v35 = vadd.f32 %v114_v34, %v113_v33 }
  0x49   :  { %v116_v36 = vrot.slane %v115_v35, 1 }
  0x4b   :  { %v117_v38 = vadd.f32 %v116_v36, %v115_v35 }
  0x4d   :  { %v118_v39 = vadd.f32 %v117_v38, %v15_v37 }
  0x4f   :  { %120 = vst.msk [vmem:[#allocation2] sm:$0x1] %vm13_vm0, %v118_v39 }
  0x50   :  { %148 = shalt.err (!%p145_p4)
}
  0x51   :  { %130 = dma.vmem_to_hbm [thread:$0]  %s128_s13, 16, %s305_s1, [#allocation3]  }
  0x52   :  { %157 = dma.done.wait [#allocation3], 16  }
  0x53   :  { %158 = vsyncadd [#allocation3], 4294967280 }
  0x54   :  { %134 = vsyncpa [#allocation3], 1 }

</bundles_post_ra>
